<compile_context>
chip_gen: v7x
topology: tpu7x:2x2x1
jax: 0.10.0
libtpu: 0.0.40
codegen_flags: <defaults>
</compile_context>

<pallas_src>
import functools

import jax
import jax.numpy as jnp
from jax.experimental import pallas as pl
from jax.experimental.pallas import tpu as pltpu


# ----------------------------- kernel ---------------------------------------


def _projection_kernel(x_ref, w_ref, b_ref, o_ref):
    # x_ref: (tm, E) f32, w_ref: (E, tf) bf16, b_ref: (1, tf) f32, o_ref: (tm, tf) f32
    # VPU cast to bf16 here (cheap) so the MXU runs its native bf16 single-pass
    # mode; keeping x f32 in HBM avoids a separate wrapper-side cast pass.
    x = x_ref[...].astype(jnp.bfloat16)
    acc = jnp.dot(x, w_ref[...], preferred_element_type=jnp.float32)
    o_ref[...] = (acc + b_ref[...]).astype(o_ref.dtype)


# ----------------------------- helpers ---------------------------------------


def _round_up(v, m):
    return ((v + m - 1) // m) * m


def _vmem_capacity_bytes():
    """Physical VMEM of the local TPU (fallback: 64 MiB, the v7x per-core size)."""
    try:
        cap = getattr(pltpu.get_tpu_info(), "vmem_capacity_bytes", None)
        if cap:
            return int(cap)
    except Exception:
        pass
    return 64 * 1024 * 1024


def _choose_f_layout(out_features):
    """Pad F to a lane-dense multiple of 128 only when the amplification is small."""
    f_pad = _round_up(out_features, 128)
    if f_pad == out_features or (f_pad - out_features) * 8 <= out_features:
        return f_pad          # <= 12.5% extra MXU work / store bytes: worth lane-density
    return out_features       # small / odd F: masked stores beat the padding blow-up


def _choose_tm(M, target):
    """Row-tile size: multiple of 8 (or == M) with >= 2 tiles for v7x's two TCs."""
    if M <= 8:
        return M
    n_tiles = max(2, pl.cdiv(M, target))
    return max(8, _round_up(pl.cdiv(M, n_tiles), 8))


# ----------------------------- projection ------------------------------------


def pallas_projection(x2d, w_bf16, b_f32):
    """x2d: (M, E) f32, w_bf16: (E, F_out) bf16, b_f32: (1, F_out) f32 -> (M, F_out) f32."""
    M, E = x2d.shape
    F_out = w_bf16.shape[1]

    cap_phys = _vmem_capacity_bytes()
    # Headroom-aware cap: 48 MiB on v7x (64 MiB physical), 96 MiB on v5e/v6e (128 MiB).
    vmem_cap = max(min(int(0.75 * cap_phys), cap_phys - 16 * 1024 * 1024),
                   16 * 1024 * 1024)
    # Bigger tiles amortize per-grid-step overhead where VMEM allows it (v5e/v6e).
    target_tm = 1024 if cap_phys >= 128 * 1024 * 1024 else 512

    tm = _choose_tm(M, target_tm)
    tf = min(F_out, 512) if F_out % 128 == 0 else F_out    # full F when unpadded

    def budget(tm_, tf_):
        return (2 * tm_ * E * 4        # f32 x tiles (cast to bf16 in-kernel), 2 buffers
                + 2 * tm_ * tf_ * 4    # f32 out tiles, 2 buffers
                + 2 * E * tf_ * 2      # bf16 weight tile (constant over inner M axis)
                + 2 * tf_ * 4          # f32 bias tile
                + 2 * 1024 * 1024)     # Mosaic internal-scratch headroom

    # Shrink tiles until the explicit footprint fits under the cap.
    while budget(tm, tf) > vmem_cap and tm > 8:
        tm = max(8, _round_up(tm // 2, 8))
    while budget(tm, tf) > vmem_cap and tf > 128 and tf % 128 == 0:
        tf = max(128, _round_up(tf // 2, 128))
    vmem_limit = int(min(vmem_cap, max(budget(tm, tf), 8 * 1024 * 1024)))

    # F axis outermost so the (E, tf) weight tile stays resident across the M sweep.
    grid = (pl.cdiv(F_out, tf), pl.cdiv(M, tm))

    return pl.pallas_call(
        _projection_kernel,
        out_shape=jax.ShapeDtypeStruct((M, F_out), jnp.float32),
        grid_spec=pltpu.PrefetchScalarGridSpec(
            num_scalar_prefetch=0,
            grid=grid,
            in_specs=[
                pl.BlockSpec((tm, E), lambda j, i: (i, 0)),     # x tile (streamed over M)
                pl.BlockSpec((E, tf), lambda j, i: (0, j)),     # bf16 weight tile (resident)
                pl.BlockSpec((1, tf), lambda j, i: (0, j)),     # f32 bias tile (resident)
            ],
            out_specs=pl.BlockSpec((tm, tf), lambda j, i: (i, j)),
        ),
        compiler_params=pltpu.CompilerParams(
            dimension_semantics=("parallel", "parallel"),
            vmem_limit_bytes=vmem_limit,
        ),
        cost_estimate=pl.CostEstimate(
            flops=2 * M * E * F_out,
            transcendentals=0,
            bytes_accessed=4 * M * E + 2 * E * F_out + 4 * F_out + 4 * M * F_out,
        ),
    )(x2d, w_bf16, b_f32)


@functools.partial(
    jax.jit,
    static_argnames=("image_size", "patch_size", "output_dims", "out_features"),
)
def output_projection_forward(x, w_bf16, b_f32, *, image_size, patch_size,
                              output_dims, out_features):
    """x: (B, N, E) -> (B, C, image_size, image_size)."""
    B, N, E = x.shape
    P = patch_size
    C = output_dims
    G = image_size // P

    # Hot path: Linear on the MXU (bf16 operands, f32 accumulate + f32 bias).
    y = pallas_projection(x.reshape(B * N, E), w_bf16, b_f32)
    if y.shape[1] != out_features:
        y = y[:, :out_features]          # only taken when F was padded to a lane multiple

    # Fold with stride == kernel_size: pure rearrangement,
    # y[b, rb*G + cb, c*P*P + i*P + j] -> out[b, c, rb*P + i, cb*P + j].
    # NOTE: this is a separate XLA transpose pass over B*C*H*W elements; a
    # pallas_call is a custom call, so XLA cannot fuse it with the kernel store.
    # TODO(synk): for large images write the folded layout directly from the
    # kernel via a (B, C, G, P, W)-shaped out_spec + in-kernel XLU rearrangement.
    y = y.reshape(B, G, G, C, P, P)
    y = jnp.transpose(y, (0, 3, 1, 4, 2, 5))      # (B, C, G, P, G, P)
    return y.reshape(B, C, G * P, G * P)          # NCHW


class OutputProjection:
    """JAX/Pallas port of the PyTorch OutputProjection module."""

    def __init__(self, image_size, patch_size, embed_size, output_dims, key):
        self.image_size = image_size
        self.patch_size = patch_size
        self.embed_size = embed_size
        self.output_dims = output_dims
        self.out_features = patch_size * patch_size * output_dims
        self.f_out = _choose_f_layout(self.out_features)

        kw, kb = jax.random.split(key)
        # Deterministic init mirroring nn.Linear's uniform(-1/sqrt(E), 1/sqrt(E)).
        bound = 1.0 / (embed_size ** 0.5)
        # Stored transposed: (E, F) so the kernel computes x @ W_t + b.
        weight_t = jax.random.uniform(
            kw, (embed_size, self.out_features), jnp.float32, -bound, bound)
        bias = jax.random.uniform(
            kb, (self.out_features,), jnp.float32, -bound, bound)

        pad = self.f_out - self.out_features
        self.bias = bias                                                # (F,)  f32 reference
        # bf16 weight for the MXU (one-time cast at init); f32 bias for the accumulator add.
        self.weight_bf16 = jnp.pad(
            weight_t, ((0, 0), (0, pad))).astype(jnp.bfloat16)          # (E, F_out)
        self.bias_f32 = jnp.pad(bias, (0, pad)).reshape(1, self.f_out)  # (1, F_out)

    def __call__(self, x):
        B, N, E = x.shape
        G = self.image_size // self.patch_size
        assert N == G * G and E == self.embed_size
        return output_projection_forward(
            x, self.weight_bf16, self.bias_f32,
            image_size=self.image_size, patch_size=self.patch_size,
            output_dims=self.output_dims, out_features=self.out_features)


if __name__ == "__main__":
    # Small shapes consistent with the module's forward.
    image_size = 16
    patch_size = 4
    embed_size = 32
    output_dims = 3
    B = 2
    N = (image_size // patch_size) ** 2   # 16 patches -> M = B*N = 32

    key = jax.random.PRNGKey(0)
    k_param, k_x = jax.random.split(key)

    module = OutputProjection(image_size, patch_size, embed_size, output_dims,
                              key=k_param)
    x = jax.random.normal(k_x, (B, N, embed_size), dtype=jnp.float32)

    out = jax.block_until_ready(module(x))

    # Pure-JAX reference on the same bf16-rounded operands (f32 accumulate).
    G = image_size // patch_size
    P, C = patch_size, output_dims
    x_bf = x.astype(jnp.bfloat16).astype(jnp.float32)
    w_bf = module.weight_bf16[:, :module.out_features].astype(jnp.float32)
    ref = x_bf.reshape(B * N, embed_size) @ w_bf + module.bias
    ref = ref.reshape(B, G, G, C, P, P)
    ref = jnp.transpose(ref, (0, 3, 1, 4, 2, 5)).reshape(
        B, C, image_size, image_size)

    assert out.shape == (B, output_dims, image_size, image_size)
    assert jnp.allclose(out, ref, atol=2e-3, rtol=2e-3), \
        float(jnp.max(jnp.abs(out - ref)))

    print("KERNEL_OK")
</pallas_src>

<mosaic_0001>
module attributes {stable_mosaic.version = 11 : i64} {
  func.func @_projection_kernel(%arg0: i32, %arg1: i32, %arg2: memref<16x32xf32, #tpu.memory_space<vmem>>, %arg3: memref<32x48xbf16, #tpu.memory_space<vmem>>, %arg4: memref<1x48xf32, #tpu.memory_space<vmem>>, %arg5: memref<16x48xf32, #tpu.memory_space<vmem>>) attributes {dimension_semantics = [#tpu.dimension_semantics<parallel>, #tpu.dimension_semantics<parallel>], iteration_bounds = array<i64: 1, 2>, scalar_prefetch = 0 : i64, scratch_operands = 0 : i64, tpu.core_type = #tpu.core_type<tc>, window_params = [{transform_indices = @transform_0, window_bounds = array<i64: 16, 32>}, {transform_indices = @transform_1, window_bounds = array<i64: 32, 48>}, {transform_indices = @transform_2, window_bounds = array<i64: 1, 48>}, {transform_indices = @transform_3, window_bounds = array<i64: 16, 48>}]} {
    %c0 = arith.constant 0 : index
    %c0_0 = arith.constant 0 : index
    %0 = vector.load %arg2[%c0, %c0_0] : memref<16x32xf32, #tpu.memory_space<vmem>>, vector<16x32xf32>
    %1 = arith.truncf %0 : vector<16x32xf32> to vector<16x32xbf16>
    %c0_1 = arith.constant 0 : index
    %c0_2 = arith.constant 0 : index
    %2 = vector.load %arg3[%c0_1, %c0_2] : memref<32x48xbf16, #tpu.memory_space<vmem>>, vector<32x48xbf16>
    %cst = arith.constant dense<0.000000e+00> : vector<16x48xf32>
    %3 = tpu.matmul %1, %2, %cst {dimension_numbers = #tpu.dot_dimension_numbers<[1], [0], [0], [1], [0, 0, 1, 1], [], []>} : vector<16x32xbf16>, vector<32x48xbf16>, vector<16x48xf32> -> vector<16x48xf32>
    %c0_3 = arith.constant 0 : index
    %c0_4 = arith.constant 0 : index
    %4 = vector.load %arg4[%c0_3, %c0_4] : memref<1x48xf32, #tpu.memory_space<vmem>>, vector<1x48xf32>
    %5 = vector.broadcast %4 : vector<1x48xf32> to vector<16x48xf32>
    %6 = arith.addf %3, %5 : vector<16x48xf32>
    %c0_5 = arith.constant 0 : index
    %c0_6 = arith.constant 0 : index
    %7 = vector.load %arg5[%c0_5, %c0_6] : memref<16x48xf32, #tpu.memory_space<vmem>>, vector<16x48xf32>
    tpu.vector_store %arg5[%c0_5, %c0_6], %6 {strides = array<i32>} : memref<16x48xf32, #tpu.memory_space<vmem>>, vector<16x48xf32>,
    return
  }
  func.func @transform_0(%arg0: i32, %arg1: i32) -> (i32, i32) {
    %c0_i32 = arith.constant 0 : i32
    %c0_i32_0 = arith.constant 0 : i32
    return %arg1, %c0_i32 : i32, i32
  }
  func.func @transform_1(%arg0: i32, %arg1: i32) -> (i32, i32) {
    %c0_i32 = arith.constant 0 : i32
    %c0_i32_0 = arith.constant 0 : i32
    return %c0_i32, %arg0 : i32, i32
  }
  func.func @transform_2(%arg0: i32, %arg1: i32) -> (i32, i32) {
    %c0_i32 = arith.constant 0 : i32
    %c0_i32_0 = arith.constant 0 : i32
    return %c0_i32, %arg0 : i32, i32
  }
  func.func @transform_3(%arg0: i32, %arg1: i32) -> (i32, i32) {
    %c0_i32 = arith.constant 0 : i32
    return %arg1, %arg0 : i32, i32
  }
}

</mosaic_0001>

<bundles_post_ra>
// kernel: output_projection_forward.1
= control target key start
LH: loop header
LB: loop body
LE: loop exit
PB: predicated region body
PF: predicated region fallthrough
CT: control target
= control target key end

     0   :  { %8 = vsyncpa [#allocation3], 0  ;;  %s842_s0 = inlined_call_operand.hbm [shape: f32[32,32], index: 0, kind: input, shape index: {}]   ;;  %s843_s1 = inlined_call_operand.hbm [shape: bf16[32,48], index: 1, kind: input, shape index: {}]   ;;  %s844_s2 = inlined_call_operand.vmem [shape: f32[1,48], index: 2, kind: input, shape index: {}]   ;;  %s845_s3 = inlined_call_operand.vmem [shape: f32[32,48], index: 3, kind: output, shape index: {}]  }
   0x1   :  { %10 = vsyncpa [#allocation3 + $0x1], 0 }
   0x2   :  { %11 = vsyncpa [#allocation5], 0  ;;  %s682_s12 = smov 0   ;;  %s684_s13 = smov 0  }
   0x3   :  { %s686_s14 = smov 0   ;;  %s688_s15 = smov 0  }
   0x4   :  { %s690_s16 = smov 0   ;;  %s692_s17 = smov 0  }
   0x5 LB: > { %s434_s18 = sadd.s32 4294967295, %s652_s17   ;;  %p49_p0 = scmp.ne.s32.totalorder %s636_s13, %s632_s12  ;;  %s652_s17 = sphi %s692_s17, %s17_s17   ;;  %s648_s16 = sphi %s690_s16, %s862_s16   ;;  %s644_s15 = sphi %s688_s15, %s861_s15   ;;  %s640_s14 = sphi %s686_s14, %s860_s14   ;;  %s636_s13 = sphi %s684_s13, %s859_s13   ;;  %s632_s12 = sphi %s682_s12, %s858_s12  }
   0x6   : > { %p712_p1 = scmp.eq.s32.totalorder %s434_s18, 0  ;;  %p436_p2 = scmp.ge.s32.totalorder %s652_s17, 1 }
   0x7   : > { %p140_p3 = scmp.lt.s32.totalorder %s652_s17, 3  ;;  %s654_s22 = smov [#allocation4]  }
   0x8   : > { %s850_s19 = scalar_select %p712_p1, 1, 0 }
   0x9   : > { %p720_p4 = por %p712_p1, %p49_p0  ;;  %p724_p5 = pnand %p436_p2, %p140_p3 }
   0xa   : > { %s154_s23 = sshll.u32 %s654_s22, 4  ;;  %s26_s25 = sadd.s32 1, %s648_s16  ;;  %s155_s23 = int_to_ptr.vmem [resolvable:$true] %s154_s23 }
   0xb   : > { %s851_s20 = scalar_select %p720_p4, 1, 0 }
   0xc   : > { %s852_s21 = scalar_select %p724_p5, 1, 0 }
   0xd   : > { %p472_p6 = pneg %p724_p5  ;;  %s540_s28 = scalar_lea.hbm %s843_s1, 256 }
   0xe   : > { %p541_p8 = scmp.ne.s32.totalorder %s843_s1, %s540_s28  ;;  %p547_p12 = scmp.lt.u32.totalorder %s540_s28, %s843_s1 }
   0xf   : > { %p732_p7 = pnand %p472_p6, %p712_p1 }
  0x11   : > { %p542_p9 = pneg %p732_p7 }
  0x13   : > { %p543_p10 = pnand %p542_p9, %p541_p8 }
  0x15   : > { %p544_p11 = pneg %p543_p10 }
  0x17   : > { %p549_p13 = pnand %p547_p12, %p544_p11 }
  0x19   : > { %552 = shalt.err (!%p549_p13)
}
  0x1a   : > { %s553_s6 = scalar_lea.vmem %s155_s23, 256  ;;  %p561_p6 = scmp.lt.s32.totalorder %s155_s23, %s155_s23 }
  0x1b   : > { %p554_p0 = scmp.ne.s32.totalorder %s155_s23, %s553_s6  ;;  %p562_p1 = scmp.lt.s32.totalorder %s553_s6, %s553_s6 }
  0x1d   : > { %p556_p2 = pnand %p554_p0, %p542_p9  ;;  %p563_p4 = por %p562_p1, %p561_p6 }
  0x1f   : > { %p557_p3 = pneg %p556_p2 }
  0x21   : > { %p564_p5 = pnand %p563_p4, %p557_p3 }
  0x23   : > { %567 = shalt.err (!%p564_p5)
}
  0x24   : > { %s655_s7 = smov 64   ;;  %s656_s8 = smov 4  }
  0x25   : > { %475 = dma.hbm_to_vmem [thread:$0]  (!%p732_p7), %s843_s1, 256, %s155_s23, [#allocation5], %s655_s7, %s655_s7, %s656_s8  }
  0x26   : > { %p27_p1 = scmp.ge.s32.totalorder %s26_s25, 2  ;;  %s36_s11 = sadd.s32 1, %s640_s14 }
  0x27   : > { %p43_p4 = scmp.ne.s32.totalorder %s640_s14, %s636_s13  ;;  %p44_p5 = scmp.eq.s32.totalorder %s652_s17, 0 }
  0x28   : > { %s864_s25 = smov (%p27_p1, %s26_s25), 0  ;;  %p481_p9 = scmp.lt.s32.totalorder %s652_s17, 2 }
  0x29   : > { %p45_p8 = por %p44_p5, %p43_p4  ;;  %s33_s12 = ssub.s32 %s648_s16, %s864_s25 }
  0x2a   : > { %s174_s18 = sand.u32 1, %s640_s14   ;;  %p34_p10 = scmp.eq.s32.totalorder %s33_s12, 0 }
  0x2b   : > { %s440_s22 = sshll.u32 %s174_s18, 4  ;;  %s454_s26 = sshll.u32 %s648_s16, 8 }
  0x2c   : > { %s765_s27 = scalar_select %p34_p10, %s640_s14, %s36_s11  }
  0x2d   : > { %s770_s23 = scalar_lea.hbm %s842_s0, %s454_s26  ;;  %s178_s29 = scalar_lea.vmem [#allocation2], %s440_s22 }
  0x2e   : > { %s185_s30 = sshll.u32 %s178_s29, 4  ;;  %p772_p7 = pnand %p481_p9, %p45_p8  ;;  %s776_s30 = int_to_ptr.vmem [resolvable:$true] %s185_s30 }
  0x2f   : > { %s778_s5 = scalar_lea.sflag [#allocation3], %s174_s18  ;;  %s568_s6 = scalar_lea.hbm %s770_s23, 256 }
  0x30   : > { %p569_p11 = scmp.ne.s32.totalorder %s770_s23, %s568_s6  ;;  %p570_p12 = pneg %p772_p7 }
  0x31   : > { %s573_s9 = scalar_lea.hbm %s842_s0, 512  ;;  %p574_p2 = scmp.lt.u32.totalorder %s770_s23, %s842_s0 }
  0x32   : > { %p571_p13 = pnand %p570_p12, %p569_p11  ;;  %p575_p3 = scmp.lt.u32.totalorder %s573_s9, %s568_s6 }
  0x33   : > { %p577_p1 = scmp.lt.u32.totalorder %s568_s6, %s770_s23 }
  0x34   : > { %p572_p0 = pneg %p571_p13  ;;  %p576_p6 = por %p575_p3, %p574_p2 }
  0x36   : > { %p578_p4 = por %p577_p1, %p576_p6 }
  0x38   : > { %p579_p5 = pnand %p578_p4, %p572_p0 }
  0x3a   : > { %582 = shalt.err (!%p579_p5)
}
  0x3b   : > { %s583_s12 = scalar_lea.vmem %s776_s30, 256  ;;  %s657_s18 = smov [#allocation2]  }
  0x3c   : > { %p584_p8 = scmp.ne.s32.totalorder %s776_s30, %s583_s12  ;;  %s588_s22 = sshll.u32 %s657_s18, 4  ;;  %s589_s22 = int_to_ptr.vmem [resolvable:$false] %s588_s22 }
  0x3d   : > { %s590_s26 = scalar_lea.vmem %s589_s22, 512  ;;  %p591_p11 = scmp.lt.s32.totalorder %s776_s30, %s589_s22 }
  0x3e   : > { %p586_p9 = pnand %p584_p8, %p570_p12  ;;  %p592_p13 = scmp.lt.s32.totalorder %s590_s26, %s583_s12 }
  0x40   : > { %p587_p10 = pneg %p586_p9  ;;  %p593_p2 = por %p592_p13, %p591_p11 }
  0x42   : > { %p594_p3 = pnand %p593_p2, %p587_p10 }
  0x44   : > { %597 = shalt.err (!%p594_p3)
}
  0x45   : > { %s658_s24 = smov 128   ;;  %s659_s28 = smov 8  }
  0x46   : > { %479 = dma.hbm_to_vmem [thread:$0]  (!%p772_p7), %s770_s23, 256, %s776_s30, %s778_s5, %s658_s24, %s658_s24, %s659_s28  }
  0x47   : > { %p855_p12 = scmp.ne.s32.totalorder %s852_s21, 0 }
  0x48   : > { %s199_s29 = sand.u32 (!%p855_p12), 1, %s636_s13   ;;  %p856_p0 = scmp.ne.s32.totalorder (!%p855_p12), %s851_s20, 0 }
  0x49   : > { %197 = sbr.rel (%p855_p12) target bundleno = 310 (0x136), region = 32  ;;  %s444_s6 = sshll.u32 (!%p855_p12), %s199_s29, 4 }
  0x4a   : > { %s200_s7 = scalar_lea.sflag (!%p855_p12), [#allocation3], %s199_s29  ;;  %s203_s8 = scalar_lea.vmem (!%p855_p12), [#allocation2], %s444_s6 }
  0x50   : > { %623 = dma.done.wait (%p856_p0), %s200_s7, 256  }
  0x51   : > { %625 = vsyncadd (%p856_p0), %s200_s7, 4294967040  ;;  %p857_p6 = scmp.ne.s32.totalorder %s850_s19, 0 }
  0x53   : > { %627 = dma.done.wait (%p857_p6), [#allocation5], 256  }
  0x54   : > { %629 = vsyncadd (%p857_p6), [#allocation5], 4294967040  ;;  %v660_v0 = vmov 0.0   ;;  %vm661_vm0 = vmmov 0   ;;  %v538_v1 = vld [vmem:[#allocation4] sm:$0xff]   ;;  %v539_v2 = vld [vmem:[#allocation4 + $0x8] sm:$0xff]  }
  0x55   : > { %458 = vmatprep.subr.bf16.mxu0 %v660_v0  ;;  %462 = vmatprep.mubr.msk.bf16.mxu0 %vm661_vm0, %v660_v0  ;;  %v250_v3 = vld [vmem:[%s203_s8] sm:$0xff]  ;;  %v251_v4 = vld [vmem:[%s203_s8 + $0x8] sm:$0xff]  ;;  %vm276_vm1 = vcmask 261120   ;;  %s446_s20 = sshll.u32 %s644_s15, 1  ;;  %vm321_vm2 = vcmask 392192  }
  0x56   : > { %459 = vmatpush3.bf16.msra.mxu0 %v538_v1  ;;  %v252_v5 = vpack.c.bf16 %v251_v4, %v250_v3  ;;  %p241_p7 = scmp.lt.s32.totalorder %s446_s20, 3  ;;  %v448_v6 = vld [vmem:[%s844_s2] ss:$0 sm:$0xff] }
  0x57   : > { %460 = vmatprep.subr.bf16.mxu0 %v660_v0 }
  0x58   : > { %s866_s20 = smov (!%p241_p7, %s446_s20), 3 }
  0x59   : > { %s447_s19 = sshll.u32 %s866_s20, 3 }
  0x5a   : > { %461 = vmatpush3.bf16.msra.mxu0 %v539_v2  ;;  %s247_s5 = scalar_lea.vmem %s845_s3, %s447_s19 }
  0x5d   : > { %463 = vmatmul.mubr.msk.bf16.vlgmr.msra.gmra.mrb[0].mxu0 %vm276_vm1, %v252_v5 }
 0x130   : > { %v314_v7 = vpop.f32.mrb[0].mxu0 }
 0x131   : > { %v315_v8 = vadd.f32 %v448_v6, %v314_v7  ;;  %v464_v9 = vpop.f32.mrb[1].mxu0 }
 0x132   : > { %v317_v10 = vpop.f32.mrb[2].mxu0 }
 0x133   : > { %322 = vst.msk [vmem:[%s247_s5] sm:$0xff] %vm321_vm2, %v315_v8  ;;  %v318_v11 = vadd.f32 %v448_v6, %v317_v10  ;;  %v465_v12 = vpop.f32.mrb[3].mxu0 }
 0x135   : > { %323 = vst.msk [vmem:[%s247_s5 + $0x8] sm:$0xff] %vm321_vm2, %v318_v11 }
 0x136 PF: > { %s17_s17 = sadd.s32 1, %s652_s17   ;;  %s858_s12 = smov %s636_s13 }
 0x137   : > { %p14_p1 = scmp.ge.s32.totalorder %s17_s17, 4   ;;  %s859_s13 = smov %s640_s14 }
 0x138   : > { %s860_s14 = smov %s765_s27  ;;  %s861_s15 = smov %s648_s16 }
 0x139   : > { %s862_s16 = smov %s864_s25  ;;  %16 = sbr.rel (!%p14_p1) target bundleno = 5 (0x5), region = 80 }
 0x140   :  { %352 = vsyncpa [#allocation3], 1 }
 0x141   :  { %354 = vsyncpa [#allocation3 + $0x1], 1 }
 0x142   :  { %355 = vsyncpa [#allocation5], 1 }

</bundles_post_ra>
